<compile_context>
chip_gen: v5e
topology: v5e:2x2
jax: 0.10.0
libtpu: 0.0.40
codegen_flags: <defaults>
</compile_context>

<pallas_src>
import functools

import jax
import jax.numpy as jnp
from jax import lax
from jax.experimental import pallas as pl
from jax.experimental.pallas import tpu as pltpu

P_DROP = 0.4
HIDDEN = 128
IN_FEATURES = 4
N_ACTIONS = 2


def _i32(v):
    """int32 constant from an unsigned 32-bit hex literal (two's-complement wrap)."""
    return jnp.int32(v - (1 << 32) if v >= (1 << 31) else v)


def _round_up(n, m):
    return ((n + m - 1) // m) * m


def policy_kernel(seed_ref, bdiff_ref, x_ref, w1_ref, b1_ref, wdiff_ref, out_ref,
                  *, training: bool, tm: int):
    # Shapes (feature-major, batch on the lane axis):
    #   x:     (4, TM)        w1: (128, 4)     b1: (128, 1)
    #   wdiff: (128, 1)  = (w2[1]-w2[0]) [* 1/(1-p) when training]
    #   bdiff: (1,) SMEM =  b2[1]-b2[0]
    #   out:   (2, TM)   rows = [p(action 0), p(action 1)]
    x = x_ref[...]
    w1 = w1_ref[...]

    # ---- layer1: K=4 contraction as 4 broadcast-FMAs on the VPU ----
    h = (b1_ref[...]
         + w1[:, 0:1] * x[0:1, :]
         + w1[:, 1:2] * x[1:2, :]
         + w1[:, 2:3] * x[2:3, :]
         + w1[:, 3:4] * x[3:4, :])                     # (128, TM) f32

    # ---- ReLU (commutes with the {0,1} dropout mask) ----
    h = jnp.maximum(h, 0.0)

    # ---- dropout(p=0.4): counter-based hash -> uniform -> keep mask ----
    # TODO(synk): PyTorch's RNG stream cannot be reproduced bit-exactly; the mask
    # is derived from (seed, hidden unit, global batch index) with a splitmix-style
    # integer hash instead.
    if training:
        seed = seed_ref[0]
        col0 = pl.program_id(0) * tm
        row = lax.broadcasted_iota(jnp.int32, h.shape, 0)
        col = lax.broadcasted_iota(jnp.int32, h.shape, 1) + col0
        z = row * _i32(0x9E3779B1) + col * _i32(0x85EBCA77) + seed
        z = z ^ ((z >> 16) & jnp.int32(0xFFFF))        # logical >> 16
        z = z * _i32(0x7FEB352D)
        z = z ^ ((z >> 15) & jnp.int32(0x1FFFF))       # logical >> 15
        z = z * _i32(0x846CA68B)
        z = z ^ ((z >> 16) & jnp.int32(0xFFFF))        # logical >> 16
        u = (z & jnp.int32(0x00FFFFFF)).astype(jnp.float32) * (1.0 / (1 << 24))
        # keep with prob 1-p; the 1/(1-p) scale is pre-folded into wdiff.
        h = jnp.where(u >= P_DROP, h, 0.0)

    # ---- layer2 logit difference + 2-class softmax == sigmoid(diff) ----
    d = jnp.sum(h * wdiff_ref[...], axis=0, keepdims=True) + bdiff_ref[0]   # (1, TM)
    p1 = 1.0 / (1.0 + jnp.exp(-d))
    out_ref[0:1, :] = (1.0 - p1).astype(out_ref.dtype)
    out_ref[1:2, :] = p1.astype(out_ref.dtype)


def policy_forward(params, x, seed, *, training=True):
    """Forward pass of Policy as a single gridded Pallas kernel.

    params: PyTorch-layout weights: w1 (128,4), b1 (128,), w2 (2,128), b2 (2,).
    x:      (B, 4) float32 observations.
    seed:   (1,) int32 dropout seed (ignored when training=False).
    Returns (B, 2) action probabilities (rows sum to 1).
    """
    B = x.shape[0]
    tm = min(512, _round_up(max(B, 1), 128))     # lane-aligned batch tile
    b_pad = _round_up(B, tm)
    grid = (b_pad // tm,)

    # feature-major input slab (4, B_pad); padded rows are zeros and sliced off below.
    x_t = jnp.pad(x.astype(jnp.float32), ((0, b_pad - B), (0, 0))).T

    scale = (1.0 / (1.0 - P_DROP)) if training else 1.0
    w1 = params["w1"].astype(jnp.float32)                              # (128, 4)
    b1 = params["b1"].astype(jnp.float32).reshape(HIDDEN, 1)           # (128, 1)
    wdiff = ((params["w2"][1, :] - params["w2"][0, :]) * scale).astype(
        jnp.float32).reshape(HIDDEN, 1)                                # (128, 1)
    bdiff = (params["b2"][1] - params["b2"][0]).astype(jnp.float32).reshape(1)
    seed = jnp.asarray(seed, jnp.int32).reshape(1)

    kernel = functools.partial(policy_kernel, training=training, tm=tm)
    out = pl.pallas_call(
        kernel,
        out_shape=jax.ShapeDtypeStruct((N_ACTIONS, b_pad), jnp.float32),
        grid=grid,
        in_specs=[
            pl.BlockSpec(memory_space=pltpu.MemorySpace.SMEM),         # seed
            pl.BlockSpec(memory_space=pltpu.MemorySpace.SMEM),         # bdiff
            pl.BlockSpec((IN_FEATURES, tm), lambda i: (0, i)),         # x tile
            pl.BlockSpec((HIDDEN, IN_FEATURES), lambda i: (0, 0)),     # w1 (resident)
            pl.BlockSpec((HIDDEN, 1), lambda i: (0, 0)),               # b1 (resident)
            pl.BlockSpec((HIDDEN, 1), lambda i: (0, 0)),               # wdiff (resident)
        ],
        out_specs=pl.BlockSpec((N_ACTIONS, tm), lambda i: (0, i)),
        compiler_params=pltpu.CompilerParams(
            dimension_semantics=("parallel",)),
    )(seed, bdiff, x_t, w1, b1, wdiff)

    return out[:, :B].T                                                # (B, 2)


def init_params(key):
    """PyTorch-layout init: U(-1/sqrt(fan_in), 1/sqrt(fan_in))."""
    k1, k2, k3, k4 = jax.random.split(key, 4)
    bound1 = 1.0 / jnp.sqrt(4.0)
    bound2 = 1.0 / jnp.sqrt(128.0)
    return {
        "w1": jax.random.uniform(k1, (HIDDEN, IN_FEATURES), jnp.float32, -bound1, bound1),
        "b1": jax.random.uniform(k2, (HIDDEN,), jnp.float32, -bound1, bound1),
        "w2": jax.random.uniform(k3, (N_ACTIONS, HIDDEN), jnp.float32, -bound2, bound2),
        "b2": jax.random.uniform(k4, (N_ACTIONS,), jnp.float32, -bound2, bound2),
    }


def policy_reference_eval(params, x):
    """Pure-JAX reference for eval mode (dropout = identity)."""
    h = jnp.maximum(x @ params["w1"].T + params["b1"], 0.0)
    logits = h @ params["w2"].T + params["b2"]
    return jax.nn.softmax(logits, axis=1)


if __name__ == "__main__":
    key = jax.random.PRNGKey(0)
    pkey, xkey = jax.random.split(key)

    params = init_params(pkey)
    B = 8
    x = jax.random.normal(xkey, (B, IN_FEATURES), jnp.float32)  # CartPole-like obs
    seed = jnp.array([1234], dtype=jnp.int32)

    # training mode: rows must still be valid probability distributions
    probs_train = policy_forward(params, x, seed, training=True)
    jax.block_until_ready(probs_train)
    assert probs_train.shape == (B, N_ACTIONS)
    assert bool(jnp.all(jnp.isfinite(probs_train)))
    assert bool(jnp.allclose(jnp.sum(probs_train, axis=1), 1.0, atol=1e-5))

    # eval mode: deterministic, must match the pure-JAX reference
    probs_eval = policy_forward(params, x, seed, training=False)
    jax.block_until_ready(probs_eval)
    ref = policy_reference_eval(params, x)
    assert bool(jnp.allclose(probs_eval, ref, atol=1e-5))

    print("KERNEL_OK")
</pallas_src>

<mosaic_0001>
module attributes {stable_mosaic.version = 11 : i64} {
  func.func @policy_kernel(%arg0: i32, %arg1: memref<1xi32, #tpu.memory_space<smem>>, %arg2: memref<1xf32, #tpu.memory_space<smem>>, %arg3: memref<4x128xf32, #tpu.memory_space<vmem>>, %arg4: memref<128x4xf32, #tpu.memory_space<vmem>>, %arg5: memref<128x1xf32, #tpu.memory_space<vmem>>, %arg6: memref<128x1xf32, #tpu.memory_space<vmem>>, %arg7: memref<2x128xf32, #tpu.memory_space<vmem>>) attributes {dimension_semantics = [#tpu.dimension_semantics<parallel>], iteration_bounds = array<i64: 1>, scalar_prefetch = 0 : i64, scratch_operands = 0 : i64, tpu.core_type = #tpu.core_type<tc>, window_params = [{transform_indices = @transform_0, window_bounds = array<i64: 1>}, {transform_indices = @transform_1, window_bounds = array<i64: 1>}, {transform_indices = @transform_2, window_bounds = array<i64: 4, 128>}, {pipeline_mode = #tpu.pipeline_mode<synchronous>, transform_indices = @transform_3, window_bounds = array<i64: 128, 4>}, {pipeline_mode = #tpu.pipeline_mode<synchronous>, transform_indices = @transform_4, window_bounds = array<i64: 128, 1>}, {pipeline_mode = #tpu.pipeline_mode<synchronous>, transform_indices = @transform_5, window_bounds = array<i64: 128, 1>}, {transform_indices = @transform_6, window_bounds = array<i64: 2, 128>}]} {
    %c0 = arith.constant 0 : index
    %c0_0 = arith.constant 0 : index
    %0 = vector.load %arg3[%c0, %c0_0] : memref<4x128xf32, #tpu.memory_space<vmem>>, vector<4x128xf32>
    %c0_1 = arith.constant 0 : index
    %c0_2 = arith.constant 0 : index
    %1 = vector.load %arg4[%c0_1, %c0_2] : memref<128x4xf32, #tpu.memory_space<vmem>>, vector<128x4xf32>
    %c0_3 = arith.constant 0 : index
    %c0_4 = arith.constant 0 : index
    %2 = vector.load %arg5[%c0_3, %c0_4] : memref<128x1xf32, #tpu.memory_space<vmem>>, vector<128x1xf32>
    %3 = vector.extract_strided_slice %1 {offsets = [0, 0], sizes = [128, 1], strides = [1, 1]} : vector<128x4xf32> to vector<128x1xf32>
    %4 = vector.extract_strided_slice %0 {offsets = [0, 0], sizes = [1, 128], strides = [1, 1]} : vector<4x128xf32> to vector<1x128xf32>
    %5 = vector.broadcast %3 : vector<128x1xf32> to vector<128x128xf32>
    %6 = vector.broadcast %4 : vector<1x128xf32> to vector<128x128xf32>
    %7 = arith.mulf %5, %6 : vector<128x128xf32>
    %8 = vector.broadcast %2 : vector<128x1xf32> to vector<128x128xf32>
    %9 = arith.addf %8, %7 : vector<128x128xf32>
    %10 = vector.extract_strided_slice %1 {offsets = [0, 1], sizes = [128, 1], strides = [1, 1]} : vector<128x4xf32> to vector<128x1xf32>
    %11 = vector.extract_strided_slice %0 {offsets = [1, 0], sizes = [1, 128], strides = [1, 1]} : vector<4x128xf32> to vector<1x128xf32>
    %12 = vector.broadcast %10 : vector<128x1xf32> to vector<128x128xf32>
    %13 = vector.broadcast %11 : vector<1x128xf32> to vector<128x128xf32>
    %14 = arith.mulf %12, %13 : vector<128x128xf32>
    %15 = arith.addf %9, %14 : vector<128x128xf32>
    %16 = vector.extract_strided_slice %1 {offsets = [0, 2], sizes = [128, 1], strides = [1, 1]} : vector<128x4xf32> to vector<128x1xf32>
    %17 = vector.extract_strided_slice %0 {offsets = [2, 0], sizes = [1, 128], strides = [1, 1]} : vector<4x128xf32> to vector<1x128xf32>
    %18 = vector.broadcast %16 : vector<128x1xf32> to vector<128x128xf32>
    %19 = vector.broadcast %17 : vector<1x128xf32> to vector<128x128xf32>
    %20 = arith.mulf %18, %19 : vector<128x128xf32>
    %21 = arith.addf %15, %20 : vector<128x128xf32>
    %22 = vector.extract_strided_slice %1 {offsets = [0, 3], sizes = [128, 1], strides = [1, 1]} : vector<128x4xf32> to vector<128x1xf32>
    %23 = vector.extract_strided_slice %0 {offsets = [3, 0], sizes = [1, 128], strides = [1, 1]} : vector<4x128xf32> to vector<1x128xf32>
    %24 = vector.broadcast %22 : vector<128x1xf32> to vector<128x128xf32>
    %25 = vector.broadcast %23 : vector<1x128xf32> to vector<128x128xf32>
    %26 = arith.mulf %24, %25 : vector<128x128xf32>
    %27 = arith.addf %21, %26 : vector<128x128xf32>
    %cst = arith.constant 0.000000e+00 : f32
    %28 = vector.broadcast %cst : f32 to vector<128x128xf32>
    %29 = arith.maximumf %27, %28 : vector<128x128xf32>
    %c0_5 = arith.constant 0 : index
    %30 = memref.load %arg1[%c0_5] : memref<1xi32, #tpu.memory_space<smem>>
    %c128_i32 = arith.constant 128 : i32
    %31 = arith.muli %arg0, %c128_i32 : i32
    %32 = tpu.iota {dimensions = array<i32: 0>} : vector<128x128xi32>
    %33 = tpu.iota {dimensions = array<i32: 1>} : vector<128x128xi32>
    %34 = vector.broadcast %31 : i32 to vector<128x128xi32>
    %35 = arith.addi %33, %34 : vector<128x128xi32>
    %c-1640531535_i32 = arith.constant -1640531535 : i32
    %36 = vector.broadcast %c-1640531535_i32 : i32 to vector<128x128xi32>
    %37 = arith.muli %32, %36 : vector<128x128xi32>
    %c-2048144777_i32 = arith.constant -2048144777 : i32
    %38 = vector.broadcast %c-2048144777_i32 : i32 to vector<128x128xi32>
    %39 = arith.muli %35, %38 : vector<128x128xi32>
    %40 = arith.addi %37, %39 : vector<128x128xi32>
    %41 = vector.broadcast %30 : i32 to vector<128x128xi32>
    %42 = arith.addi %40, %41 : vector<128x128xi32>
    %c16_i32 = arith.constant 16 : i32
    %43 = vector.broadcast %c16_i32 : i32 to vector<128x128xi32>
    %44 = arith.shrsi %42, %43 : vector<128x128xi32>
    %c65535_i32 = arith.constant 65535 : i32
    %45 = vector.broadcast %c65535_i32 : i32 to vector<128x128xi32>
    %46 = arith.andi %44, %45 : vector<128x128xi32>
    %47 = arith.xori %42, %46 : vector<128x128xi32>
    %c2146121005_i32 = arith.constant 2146121005 : i32
    %48 = vector.broadcast %c2146121005_i32 : i32 to vector<128x128xi32>
    %49 = arith.muli %47, %48 : vector<128x128xi32>
    %c15_i32 = arith.constant 15 : i32
    %50 = vector.broadcast %c15_i32 : i32 to vector<128x128xi32>
    %51 = arith.shrsi %49, %50 : vector<128x128xi32>
    %c131071_i32 = arith.constant 131071 : i32
    %52 = vector.broadcast %c131071_i32 : i32 to vector<128x128xi32>
    %53 = arith.andi %51, %52 : vector<128x128xi32>
    %54 = arith.xori %49, %53 : vector<128x128xi32>
    %c-2073254261_i32 = arith.constant -2073254261 : i32
    %55 = vector.broadcast %c-2073254261_i32 : i32 to vector<128x128xi32>
    %56 = arith.muli %54, %55 : vector<128x128xi32>
    %c16_i32_6 = arith.constant 16 : i32
    %57 = vector.broadcast %c16_i32_6 : i32 to vector<128x128xi32>
    %58 = arith.shrsi %56, %57 : vector<128x128xi32>
    %c65535_i32_7 = arith.constant 65535 : i32
    %59 = vector.broadcast %c65535_i32_7 : i32 to vector<128x128xi32>
    %60 = arith.andi %58, %59 : vector<128x128xi32>
    %61 = arith.xori %56, %60 : vector<128x128xi32>
    %c16777215_i32 = arith.constant 16777215 : i32
    %62 = vector.broadcast %c16777215_i32 : i32 to vector<128x128xi32>
    %63 = arith.andi %61, %62 : vector<128x128xi32>
    %64 = arith.sitofp %63 : vector<128x128xi32> to vector<128x128xf32>
    %cst_8 = arith.constant 5.96046448E-8 : f32
    %65 = vector.broadcast %cst_8 : f32 to vector<128x128xf32>
    %66 = arith.mulf %64, %65 : vector<128x128xf32>
    %cst_9 = arith.constant 4.000000e-01 : f32
    %67 = vector.broadcast %cst_9 : f32 to vector<128x128xf32>
    %68 = arith.cmpf oge, %66, %67 : vector<128x128xf32>
    %cst_10 = arith.constant 0.000000e+00 : f32
    %69 = vector.broadcast %cst_10 : f32 to vector<128x128xf32>
    %70 = arith.select %68, %29, %69 : vector<128x128xi1>, vector<128x128xf32>
    %c0_11 = arith.constant 0 : index
    %c0_12 = arith.constant 0 : index
    %71 = vector.load %arg6[%c0_11, %c0_12] : memref<128x1xf32, #tpu.memory_space<vmem>>, vector<128x1xf32>
    %72 = vector.broadcast %71 : vector<128x1xf32> to vector<128x128xf32>
    %73 = arith.mulf %70, %72 : vector<128x128xf32>
    %cst_13 = arith.constant dense<0.000000e+00> : vector<128xf32>
    %74 = vector.multi_reduction <add>, %73, %cst_13 [0] : vector<128x128xf32> to vector<128xf32>
    %75 = vector.shape_cast %74 : vector<128xf32> to vector<1x128xf32>
    %c0_14 = arith.constant 0 : index
    %76 = memref.load %arg2[%c0_14] : memref<1xf32, #tpu.memory_space<smem>>
    %77 = vector.broadcast %76 : f32 to vector<1x128xf32>
    %78 = arith.addf %75, %77 : vector<1x128xf32>
    %cst_15 = arith.constant 0.000000e+00 : f32
    %79 = vector.broadcast %cst_15 : f32 to vector<1x128xf32>
    %80 = arith.subf %79, %78 : vector<1x128xf32>
    %81 = math.exp %80 : vector<1x128xf32>
    %cst_16 = arith.constant 1.000000e+00 : f32
    %82 = vector.broadcast %cst_16 : f32 to vector<1x128xf32>
    %83 = arith.addf %82, %81 : vector<1x128xf32>
    %cst_17 = arith.constant 1.000000e+00 : f32
    %84 = vector.broadcast %cst_17 : f32 to vector<1x128xf32>
    %85 = arith.divf %84, %83 : vector<1x128xf32>
    %cst_18 = arith.constant 1.000000e+00 : f32
    %86 = vector.broadcast %cst_18 : f32 to vector<1x128xf32>
    %87 = arith.subf %86, %85 : vector<1x128xf32>
    %c0_19 = arith.constant 0 : index
    %c0_20 = arith.constant 0 : index
    %88 = vector.load %arg7[%c0_19, %c0_20] : memref<2x128xf32, #tpu.memory_space<vmem>>, vector<1x128xf32>
    tpu.vector_store %arg7[%c0_19, %c0_20], %87 {strides = array<i32>} : memref<2x128xf32, #tpu.memory_space<vmem>>, vector<1x128xf32>,
    %c1 = arith.constant 1 : index
    %c0_21 = arith.constant 0 : index
    %89 = vector.load %arg7[%c1, %c0_21] : memref<2x128xf32, #tpu.memory_space<vmem>>, vector<1x128xf32>
    tpu.vector_store %arg7[%c1, %c0_21], %85 {strides = array<i32>} : memref<2x128xf32, #tpu.memory_space<vmem>>, vector<1x128xf32>,
    return
  }
  func.func @transform_0(%arg0: i32) -> i32 {
    %c0_i32 = arith.constant 0 : i32
    %c0_i32_0 = arith.constant 0 : i32
    return %c0_i32 : i32
  }
  func.func @transform_1(%arg0: i32) -> i32 {
    %c0_i32 = arith.constant 0 : i32
    %c0_i32_0 = arith.constant 0 : i32
    return %c0_i32 : i32
  }
  func.func @transform_2(%arg0: i32) -> (i32, i32) {
    %c0_i32 = arith.constant 0 : i32
    %c0_i32_0 = arith.constant 0 : i32
    return %c0_i32, %arg0 : i32, i32
  }
  func.func @transform_3(%arg0: i32) -> (i32, i32) {
    %c0_i32 = arith.constant 0 : i32
    %c0_i32_0 = arith.constant 0 : i32
    %c0_i32_1 = arith.constant 0 : i32
    return %c0_i32, %c0_i32_0 : i32, i32
  }
  func.func @transform_4(%arg0: i32) -> (i32, i32) {
    %c0_i32 = arith.constant 0 : i32
    %c0_i32_0 = arith.constant 0 : i32
    %c0_i32_1 = arith.constant 0 : i32
    return %c0_i32, %c0_i32_0 : i32, i32
  }
  func.func @transform_5(%arg0: i32) -> (i32, i32) {
    %c0_i32 = arith.constant 0 : i32
    %c0_i32_0 = arith.constant 0 : i32
    %c0_i32_1 = arith.constant 0 : i32
    return %c0_i32, %c0_i32_0 : i32, i32
  }
  func.func @transform_6(%arg0: i32) -> (i32, i32) {
    %c0_i32 = arith.constant 0 : i32
    %c0_i32_0 = arith.constant 0 : i32
    return %c0_i32, %arg0 : i32, i32
  }
}

</mosaic_0001>

<bundles_post_ra>
// kernel: tpu_custom_call.1
= control target key start
LH: loop header
LB: loop body
LE: loop exit
PB: predicated region body
PF: predicated region fallthrough
CT: control target
= control target key end

     0   :  { %v1164_v3 = vmov 1   ;;  %v1165_v4 = vmov 0   ;;  %s1796_s0 = inlined_call_operand.<no memory space> [shape: s32[1], index: 0, kind: input, shape index: {}]   ;;  %s1797_s1 = inlined_call_operand.<no memory space> [shape: f32[1], index: 1, kind: input, shape index: {}]   ;;  %s1798_s2 = inlined_call_operand.vmem [shape: f32[4,128], index: 2, kind: input, shape index: {}]   ;;  %s1799_s3 = inlined_call_operand.vmem [shape: f32[128,4], index: 3, kind: input, shape index: {}]   ;;  %s1800_s4 = inlined_call_operand.vmem [shape: f32[128,1], index: 4, kind: input, shape index: {}]   ;;  %s1801_s5 = inlined_call_operand.vmem [shape: f32[128,1], index: 5, kind: input, shape index: {}]   ;;  %s1802_s6 = inlined_call_operand.hbm [shape: f32[2,128], index: 6, kind: output, shape index: {}]  }
   0x1   :  { %v1207_v0 = vld [vmem:[%s1799_s3 + $0x20] sm:$0xff]  ;;  %v1212_v1 = vld [vmem:[%s1799_s3 + $0x10] sm:$0xff]  ;;  %v1217_v2 = vld [vmem:[%s1799_s3 + $0x8] sm:$0xff]  ;;  %1118 = vset.pattern.permute.xlu0 %v1164_v3  ;;  %1116 = vset.pattern.permute.xlu2 %v1165_v4 }
   0x2   :  { %1115 = vset.pattern.permute.xlu1 %v1165_v4  ;;  %81 = vperm.xlu2 %1116, %v1207_v0  }
   0x3   :  { %71 = vperm.xlu1 %1115, %v1212_v1   ;;  %257 = vperm.xlu0 %1118, %v1217_v2  }
   0x4   :  { %13 = vsyncpa [#allocation5], 0  ;;  %v1228_v5 = vld [vmem:[%s1799_s3 + $0x28] sm:$0xff]  ;;  %v1233_v6 = vld [vmem:[%s1799_s3 + $0x18] sm:$0xff]  ;;  %v1166_v19 = vmov 2   ;;  %s1053_s22 = sshll.u32 %s1802_s6, 4  ;;  %s1054_s22 = int_to_ptr.hbm [resolvable:$true] %s1053_s22 }
   0x5   :  { %v1238_v7 = vld [vmem:[%s1799_s3 + $0x30] sm:$0xff]  ;;  %v1246_v8 = vld [vmem:[%s1799_s3 + $0x40] sm:$0xff]  ;;  %v1251_v9 = vld [vmem:[%s1799_s3 + $0x38] sm:$0xff] }
   0x6   :  { %v1256_v10 = vld [vmem:[%s1799_s3 + $0x48] sm:$0xff]  ;;  %v1264_v11 = vld [vmem:[%s1799_s3 + $0x58] sm:$0xff]  ;;  %v1269_v12 = vld [vmem:[%s1799_s3 + $0x50] sm:$0xff] }
   0x7   :  { %v1274_v13 = vld [vmem:[%s1799_s3 + $0x60] sm:$0xff]  ;;  %v1282_v14 = vld [vmem:[%s1799_s3 + $0x70] sm:$0xff]  ;;  %v1287_v15 = vld [vmem:[%s1799_s3 + $0x68] sm:$0xff] }
   0x8   :  { %v1292_v16 = vld [vmem:[%s1799_s3 + $0x78] sm:$0xff]  ;;  %v44_v17 = vld [vmem:[%s1800_s4 + $0x8] sm:$0xff]  ;;  %v43_v18 = vld [vmem:[%s1800_s4] sm:$0xff] }
   0x9   :  { %v47_v20 = vld [vmem:[%s1800_s4 + $0x20] sm:$0xff]  ;;  %v46_v21 = vld [vmem:[%s1800_s4 + $0x18] sm:$0xff]  ;;  %v49_v23 = vld [vmem:[%s1800_s4 + $0x30] sm:$0xff] }
   0xa   :  { %86 = vperm.xlu2 %1116, %v1228_v5   ;;  %v50_v22 = vld [vmem:[%s1800_s4 + $0x38] sm:$0xff]  ;;  %v53_v24 = vld [vmem:[%s1800_s4 + $0x50] sm:$0xff]  ;;  %v52_v25 = vld [vmem:[%s1800_s4 + $0x48] sm:$0xff] }
   0xb   :  { %76 = vperm.xlu1 %1115, %v1233_v6   ;;  %277 = vperm.xlu0 %1118, %v1238_v7   ;;  %v56_v26 = vld [vmem:[%s1800_s4 + $0x68] sm:$0xff]  ;;  %v55_v27 = vld [vmem:[%s1800_s4 + $0x60] sm:$0xff]  ;;  %v58_v29 = vld [vmem:[%s1800_s4 + $0x78] sm:$0xff] }
   0xc   :  { %v1334_v28 = vld [vmem:[%s1799_s3] sm:$0xff]  ;;  %v45_v36 = vld [vmem:[%s1800_s4 + $0x10] sm:$0xff]  ;;  %v48_v40 = vld [vmem:[%s1800_s4 + $0x28] sm:$0xff] }
   0xd   :  { %v1388_v44 = vld [vmem:[%s1798_s2] sm:$0xf]  ;;  %v54_v52 = vld [vmem:[%s1800_s4 + $0x58] sm:$0xff]  ;;  %v57_v58 = vld [vmem:[%s1800_s4 + $0x70] sm:$0xff] }
   0xe   :  { %v1391_v45 = vperm.slane %v1388_v44, 0  ;;  %v51_v46 = vld [vmem:[%s1800_s4 + $0x40] sm:$0xff] }
  0x12   :  { %101 = vperm.xlu2 %1116, %v1246_v8  }
  0x13   :  { %96 = vperm.xlu1 %1115, %v1251_v9   ;;  %289 = vperm.xlu0 %1118, %v1256_v10  }
  0x1a   :  { %116 = vperm.xlu2 %1116, %v1264_v11  }
  0x1b   :  { %111 = vperm.xlu1 %1115, %v1269_v12   ;;  %301 = vperm.xlu0 %1118, %v1274_v13  }
  0x22   :  { %131 = vperm.xlu2 %1116, %v1282_v14  }
  0x23   :  { %126 = vperm.xlu1 %1115, %v1287_v15   ;;  %313 = vperm.xlu0 %1118, %v1292_v16  }
  0x2a   :  { %163 = vperm.xlu2 %1116, %v44_v17  }
  0x2b   :  { %158 = vperm.xlu1 %1115, %v43_v18   ;;  %1122 = vset.pattern.permute.xlu0 %v1166_v19 }
  0x2c   :  { %358 = vperm.xlu0 %1122, %v1212_v1  }
  0x32   :  { %178 = vperm.xlu2 %1116, %v47_v20  }
  0x33   :  { %173 = vperm.xlu1 %1115, %v46_v21  }
  0x34   :  { %378 = vperm.xlu0 %1122, %v1251_v9  }
  0x3a   :  { %193 = vperm.xlu2 %1116, %v50_v22  }
  0x3b   :  { %188 = vperm.xlu1 %1115, %v49_v23  }
  0x3c   :  { %390 = vperm.xlu0 %1122, %v1269_v12  }
  0x42   :  { %208 = vperm.xlu2 %1116, %v53_v24   ;;  %v894_v24 = vld [vmem:[%s1801_s5 + $0x30] sm:$0xff] }
  0x43   :  { %203 = vperm.xlu1 %1115, %v52_v25  }
  0x44   :  { %402 = vperm.xlu0 %1122, %v1287_v15  }
  0x4a   :  { %223 = vperm.xlu2 %1116, %v56_v26  }
  0x4b   :  { %218 = vperm.xlu1 %1115, %v55_v27  }
  0x4c   :  { %1123 = vset.pattern.permute.xlu0 %v1165_v4 }
  0x4d   :  { %61 = vperm.xlu0 %1123, %v1334_v28  }
  0x52   :  { %1117 = vset.pattern.permute.xlu2 %v1164_v3 }
  0x53   :  { %233 = vperm.xlu1 %1115, %v58_v29   ;;  %253 = vperm.xlu2 %1117, %v1334_v28   ;;  %v897_v29 = vld [vmem:[%s1801_s5 + $0x48] sm:$0xff] }
  0x55   :  { %66 = vperm.xlu0 %1123, %v1217_v2  }
  0x5b   :  { %1119 = vset.pattern.permute.xlu1 %v1164_v3  ;;  %265 = vperm.xlu2 %1117, %v1233_v6   ;;  %v889_v3 = vld [vmem:[%s1801_s5 + $0x8] sm:$0xff] }
  0x5c   :  { %261 = vperm.xlu1 %1119, %v1212_v1   ;;  %v82_v30 = vpop.permute.xlu2 %81 }
  0x5d   :  { %91 = vperm.xlu0 %1123, %v1238_v7   ;;  %v144_v47 = vmul.f32 %v1391_v45, %v82_v30  ;;  %v1445_v30 = vperm.slane %v1388_v44, 1 }
  0x63   :  { %273 = vperm.xlu2 %1117, %v1228_v5  }
  0x64   :  { %269 = vperm.xlu1 %1119, %v1207_v0   ;;  %v1350_v31 = vpop.permute.xlu2 %86 }
  0x65   :  { %106 = vperm.xlu0 %1123, %v1256_v10  }
  0x6b   :  { %285 = vperm.xlu2 %1117, %v1246_v8  }
  0x6c   :  { %281 = vperm.xlu1 %1119, %v1251_v9   ;;  %v1355_v32 = vpop.permute.xlu2 %101 }
  0x6d   :  { %121 = vperm.xlu0 %1123, %v1274_v13  }
  0x73   :  { %297 = vperm.xlu2 %1117, %v1264_v11  }
  0x74   :  { %293 = vperm.xlu1 %1119, %v1269_v12   ;;  %v1360_v33 = vpop.permute.xlu2 %116 }
  0x75   :  { %v1362_v34 = vpop.permute.xlu1 %71  ;;  %136 = vperm.xlu0 %1123, %v1292_v16   ;;  %v1365_v35 = vpop.permute.xlu0 %257 }
  0x7b   :  { %309 = vperm.xlu2 %1117, %v1282_v14  }
  0x7c   :  { %305 = vperm.xlu1 %1119, %v1287_v15   ;;  %v1372_v37 = vpop.permute.xlu2 %131 }
  0x7d   :  { %v77_v38 = vpop.permute.xlu1 %76  ;;  %168 = vperm.xlu0 %1123, %v45_v36   ;;  %v1374_v39 = vpop.permute.xlu0 %277  ;;  %v1167_v36 = vmov 3  }
  0x7e   :  { %v143_v18 = vmul.f32 %v1391_v45, %v77_v38 }
  0x83   :  { %1121 = vset.pattern.permute.xlu2 %v1166_v19 }
  0x84   :  { %1120 = vset.pattern.permute.xlu1 %v1166_v19  ;;  %v1379_v41 = vpop.permute.xlu2 %163  ;;  %354 = vperm.xlu2 %1121, %v1217_v2  }
  0x85   :  { %v97_v42 = vpop.permute.xlu1 %96  ;;  %183 = vperm.xlu0 %1123, %v48_v40   ;;  %350 = vperm.xlu1 %1120, %v1334_v28   ;;  %v1383_v43 = vpop.permute.xlu0 %289 }
  0x86   :  { %v147_v53 = vmul.f32 %v1391_v45, %v97_v42 }
  0x8c   :  { %v179_v48 = vpop.permute.xlu2 %178  ;;  %366 = vperm.xlu2 %1121, %v1207_v0  }
  0x8d   :  { %v1398_v49 = vadd.f32 %v179_v48, %v144_v47  ;;  %v112_v50 = vpop.permute.xlu1 %111  ;;  %198 = vperm.xlu0 %1123, %v51_v46   ;;  %362 = vperm.xlu1 %1120, %v1233_v6   ;;  %v1401_v51 = vpop.permute.xlu0 %301 }
  0x8e   :  { %v150_v59 = vmul.f32 %v1391_v45, %v112_v50 }
  0x94   :  { %v194_v54 = vpop.permute.xlu2 %193  ;;  %374 = vperm.xlu2 %1121, %v1238_v7  }
  0x95   :  { %v1408_v55 = vadd.f32 %v194_v54, %v147_v53  ;;  %v127_v56 = vpop.permute.xlu1 %126  ;;  %213 = vperm.xlu0 %1123, %v54_v52   ;;  %370 = vperm.xlu1 %1120, %v1228_v5   ;;  %v1411_v57 = vpop.permute.xlu0 %313 }
  0x96   :  { %v153_v17 = vmul.f32 %v1391_v45, %v127_v56 }
  0x9c   :  { %v209_v60 = vpop.permute.xlu2 %208  ;;  %386 = vperm.xlu2 %1121, %v1256_v10  }
  0x9d   :  { %v1418_v61 = vadd.f32 %v209_v60, %v150_v59  ;;  %v159_v62 = vpop.permute.xlu1 %158  ;;  %228 = vperm.xlu0 %1123, %v57_v58   ;;  %382 = vperm.xlu1 %1120, %v1246_v8  }
  0x9e   :  { %v1421_v63 = vpop.permute.xlu0 %358 }
  0xa4   :  { %v224_v19 = vpop.permute.xlu2 %223  ;;  %398 = vperm.xlu2 %1121, %v1274_v13  }
  0xa5   :  { %v1429_v20 = vadd.f32 %v224_v19, %v153_v17  ;;  %v174_v21 = vpop.permute.xlu1 %173  ;;  %911 = vperm.xlu0 %1123, %v889_v3   ;;  %394 = vperm.xlu1 %1120, %v1264_v11  }
  0xa6   :  { %v239_v22 = vadd.f32 %v174_v21, %v143_v18  ;;  %v1432_v23 = vpop.permute.xlu0 %378  ;;  %v888_v18 = vld [vmem:[%s1801_s5] sm:$0xff]  ;;  %v326_v21 = vmul.f32 %v1445_v30, %v1383_v43 }
  0xac   :  { %410 = vperm.xlu2 %1121, %v1292_v16  }
  0xad   :  { %v189_v25 = vpop.permute.xlu1 %188  ;;  %936 = vperm.xlu0 %1123, %v894_v24   ;;  %406 = vperm.xlu1 %1120, %v1282_v14   ;;  %v254_v26 = vpop.permute.xlu2 %253 }
  0xae   :  { %v1439_v27 = vpop.permute.xlu0 %390 }
  0xb4   :  { %1125 = vset.pattern.permute.xlu2 %v1167_v36 }
  0xb5   :  { %v204_v38 = vpop.permute.xlu1 %203  ;;  %951 = vperm.xlu0 %1123, %v897_v29   ;;  %1124 = vset.pattern.permute.xlu1 %v1167_v36  ;;  %v266_v40 = vpop.permute.xlu2 %265 }
  0xb6   :  { %451 = vperm.xlu1 %1124, %v1217_v2   ;;  %455 = vperm.xlu2 %1125, %v1212_v1   ;;  %v320_v42 = vmul.f32 %v1445_v30, %v266_v40  ;;  %v1452_v46 = vpop.permute.xlu0 %402  ;;  %v317_v1 = vmul.f32 %v1445_v30, %v254_v26 }
  0xb8   :  { %v1454_v47 = vadd.f32 %v320_v42, %v239_v22 }
  0xbd   :  { %v219_v48 = vpop.permute.xlu1 %218  ;;  %1128 = vset.pattern.permute.xlu0 %v1167_v36  ;;  %v1457_v50 = vpop.permute.xlu2 %273 }
  0xbe   :  { %447 = vperm.xlu0 %1128, %v1334_v28   ;;  %459 = vperm.xlu1 %1124, %v1233_v6   ;;  %v318_v28 = vmul.f32 %v1445_v30, %v1365_v35 }
  0xbf   :  { %463 = vperm.xlu2 %1125, %v1207_v0   ;;  %v62_v2 = vpop.permute.xlu0 %61 }
  0xc0   :  { %v140_v52 = vmul.f32 %v1391_v45, %v62_v2 }
  0xc2   :  { %v236_v53 = vadd.f32 %v159_v62, %v140_v52 }
  0xc4   :  { %v1464_v54 = vadd.f32 %v317_v1, %v236_v53 }
  0xc5   :  { %v1466_v56 = vpop.permute.xlu1 %233  ;;  %v1468_v58 = vpop.permute.xlu2 %285 }
  0xc6   :  { %467 = vperm.xlu0 %1128, %v1228_v5   ;;  %471 = vperm.xlu1 %1124, %v1238_v7  }
  0xc7   :  { %475 = vperm.xlu2 %1125, %v1251_v9   ;;  %v67_v6 = vpop.permute.xlu0 %66  ;;  %v323_v9 = vmul.f32 %v1445_v30, %v1374_v39 }
  0xc8   :  { %v141_v0 = vmul.f32 %v1391_v45, %v67_v6  ;;  %v902_v6 = vld [vmem:[%s1801_s5 + $0x70] sm:$0xff] }
  0xca   :  { %v237_v59 = vadd.f32 %v1379_v41, %v141_v0  ;;  %v892_v0 = vld [vmem:[%s1801_s5 + $0x20] sm:$0xff] }
  0xcc   :  { %v334_v60 = vadd.f32 %v318_v28, %v237_v59 }
  0xcd   :  { %v1477_v62 = vpop.permute.xlu2 %297 }
  0xce   :  { %v1479_v3 = vpop.permute.xlu1 %261  ;;  %479 = vperm.xlu0 %1128, %v1246_v8   ;;  %483 = vperm.xlu1 %1124, %v1256_v10  }
  0xcf   :  { %487 = vperm.xlu2 %1125, %v1269_v12   ;;  %v92_v5 = vpop.permute.xlu0 %91 }
  0xd0   :  { %v146_v7 = vmul.f32 %v1391_v45, %v92_v5 }
  0xd2   :  { %v242_v35 = vadd.f32 %v189_v25, %v146_v7  ;;  %v891_v25 = vld [vmem:[%s1801_s5 + $0x18] sm:$0xff] }
  0xd4   :  { %v1487_v17 = vadd.f32 %v323_v9, %v242_v35 }
  0xd5   :  { %v1489_v41 = vpop.permute.xlu2 %309 }
  0xd6   :  { %v270_v8 = vpop.permute.xlu1 %269  ;;  %491 = vperm.xlu0 %1128, %v1264_v11   ;;  %495 = vperm.xlu1 %1124, %v1274_v13   ;;  %v890_v11 = vld [vmem:[%s1801_s5 + $0x10] sm:$0xff]  ;;  %v1508_v13 = vperm.slane %v1388_v44, 2 }
  0xd7   :  { %v321_v10 = vmul.f32 %v1445_v30, %v270_v8  ;;  %1126 = vset.pattern.permute.xlu2 %v1165_v4  ;;  %v107_v12 = vpop.permute.xlu0 %106 }
  0xd8   :  { %v149_v39 = vmul.f32 %v1391_v45, %v107_v12  ;;  %906 = vperm.xlu2 %1126, %v888_v18   ;;  %v421_v42 = vmul.f32 %v1508_v13, %v1432_v23  ;;  %v424_v7 = vmul.f32 %v1508_v13, %v1439_v27  ;;  %v332_v18 = vmul.f32 %v1445_v30, %v1411_v57  ;;  %v895_v12 = vld [vmem:[%s1801_s5 + $0x38] sm:$0xff]  ;;  %v896_v27 = vld [vmem:[%s1801_s5 + $0x40] sm:$0xff] }
  0xd9   :  { %v337_v19 = vadd.f32 %v321_v10, %v1398_v49 }
  0xda   :  { %v245_v22 = vadd.f32 %v204_v38, %v149_v39 }
  0xdc   :  { %v1505_v24 = vadd.f32 %v326_v21, %v245_v22 }
  0xde   :  { %v282_v26 = vpop.permute.xlu1 %281  ;;  %503 = vperm.xlu0 %1128, %v1282_v14   ;;  %1127 = vset.pattern.permute.xlu1 %v1165_v4  ;;  %v355_v43 = vpop.permute.xlu2 %354  ;;  %v329_v14 = vmul.f32 %v1445_v30, %v1401_v51 }
  0xdf   :  { %v324_v49 = vmul.f32 %v1445_v30, %v282_v26  ;;  %v122_v29 = vpop.permute.xlu0 %121  ;;  %916 = vperm.xlu1 %1127, %v890_v11   ;;  %v415_v38 = vmul.f32 %v1508_v13, %v355_v43  ;;  %v319_v11 = vmul.f32 %v1445_v30, %v1479_v3  ;;  %v561_v26 = vlaneseq }
  0xe0   :  { %v152_v40 = vmul.f32 %v1391_v45, %v122_v29  ;;  %921 = vperm.xlu2 %1126, %v891_v25   ;;  %v427_v43 = vmul.f32 %v1508_v13, %v1452_v46  ;;  %v416_v29 = vmul.f32 %v1508_v13, %v1421_v63 }
  0xe1   :  { %v340_v2 = vadd.f32 %v324_v49, %v1408_v55  ;;  %v1521_v1 = vadd.f32 %v415_v38, %v334_v60  ;;  %v893_v55 = vld [vmem:[%s1801_s5 + $0x28] sm:$0xff]  ;;  %v1578_v3 = vshrl.u32 %v561_v26, 7 }
  0xe2   :  { %v248_v52 = vadd.f32 %v219_v48, %v152_v40 }
  0xe3   :  { %v1525_v53 = vadd.f32 %v421_v42, %v340_v2  ;;  %v898_v2 = vld [vmem:[%s1801_s5 + $0x50] sm:$0xff] }
  0xe4   :  { %v1533_v28 = vadd.f32 %v329_v14, %v248_v52 }
  0xe6   :  { %v294_v23 = vpop.permute.xlu1 %293  ;;  %1133 = vset.pattern.permute.xlu0 %v1165_v4  ;;  %v367_v51 = vpop.permute.xlu2 %366 }
  0xe7   :  { %v327_v48 = vmul.f32 %v1445_v30, %v294_v23  ;;  %976 = vperm.xlu0 %1133, %v902_v6   ;;  %v137_v59 = vpop.permute.xlu0 %136  ;;  %926 = vperm.xlu1 %1127, %v892_v0   ;;  %v418_v60 = vmul.f32 %v1508_v13, %v367_v51  ;;  %v322_v6 = vmul.f32 %v1445_v30, %v1457_v50  ;;  %v579_v23 = vand.u32 127, %v561_v26 }
  0xe8   :  { %v155_v5 = vmul.f32 %v1391_v45, %v137_v59  ;;  %931 = vperm.xlu2 %1126, %v893_v55   ;;  %v148_v50 = vmul.f32 %v1391_v45, %v1355_v32 }
  0xe9   :  { %v343_v9 = vadd.f32 %v327_v48, %v1418_v61  ;;  %v1545_v35 = vadd.f32 %v418_v60, %v337_v19  ;;  %v142_v61 = vmul.f32 %v1391_v45, %v1362_v34  ;;  %v1598_v60 = vmul.u32 2246822519, %v579_v23 }
  0xea   :  { %v251_v8 = vadd.f32 %v1466_v56, %v155_v5  ;;  %v582_v5 = vmul.u32 2654435761, %v1578_v3 }
  0xeb   :  { %v1550_v10 = vadd.f32 %v424_v7, %v343_v9  ;;  %v325_v9 = vmul.f32 %v1445_v30, %v1468_v58  ;;  %v1621_v58 = vstv %s1796_s0 }
  0xec   :  { %v1555_v39 = vadd.f32 %v332_v18, %v251_v8  ;;  %v599_v32 = vadd.s32 %v1598_v60, %v582_v5 }
  0xee   :  { %v306_v19 = vpop.permute.xlu1 %305  ;;  %v375_v21 = vpop.permute.xlu2 %374 }
  0xef   :  { %v330_v57 = vmul.f32 %v1445_v30, %v306_v19  ;;  %v169_v56 = vpop.permute.xlu0 %168  ;;  %941 = vperm.xlu1 %1127, %v895_v12   ;;  %v420_v22 = vmul.f32 %v1508_v13, %v375_v21 }
  0xf0   :  { %v238_v25 = vadd.f32 %v169_v56, %v142_v61  ;;  %946 = vperm.xlu2 %1126, %v896_v27  }
  0xf1   :  { %v346_v49 = vadd.f32 %v330_v57, %v1429_v20  ;;  %v1570_v34 = vadd.f32 %v420_v22, %v1487_v17  ;;  %v145_v20 = vmul.f32 %v1391_v45, %v1350_v31  ;;  %v563_v17 = vadd.s32 8, %v1578_v3 }
  0xf2   :  { %v335_v38 = vadd.f32 %v319_v11, %v238_v25  ;;  %v616_v57 = vadd.s32 %v1621_v58, %v599_v32 }
  0xf3   :  { %v1574_v40 = vadd.f32 %v427_v43, %v346_v49  ;;  %v583_v59 = vmul.u32 2654435761, %v563_v17  ;;  %v328_v43 = vmul.f32 %v1445_v30, %v1477_v62  ;;  %v564_v17 = vadd.s32 16, %v1578_v3 }
  0xf4   :  { %v1576_v42 = vadd.f32 %v416_v29, %v335_v38  ;;  %v1062_v29 = vshrl.u32 %v616_v57, 16  ;;  %v154_v62 = vmul.f32 %v1391_v45, %v1372_v37 }
  0xf6   :  { %v387_v46 = vpop.permute.xlu2 %386 }
  0xf7   :  { %v184_v14 = vpop.permute.xlu0 %183  ;;  %1129 = vset.pattern.permute.xlu1 %v1167_v36  ;;  %v351_v63 = vpop.permute.xlu1 %350  ;;  %v423_v52 = vmul.f32 %v1508_v13, %v387_v46 }
  0xf8   :  { %v241_v0 = vadd.f32 %v184_v14, %v145_v20  ;;  %v414_v55 = vmul.f32 %v1508_v13, %v351_v63  ;;  %956 = vperm.xlu2 %1126, %v898_v2   ;;  %499 = vperm.xlu1 %1129, %v1287_v15   ;;  %v899_v15 = vld [vmem:[%s1801_s5 + $0x58] sm:$0xff]  ;;  %v664_v14 = vxor.u32 %v1062_v29, %v616_v57 }
  0xf9   :  { %v1593_v31 = vadd.f32 %v423_v52, %v1505_v24  ;;  %v600_v24 = vadd.s32 %v1598_v60, %v583_v59  ;;  %v903_v63 = vld [vmem:[%s1801_s5 + $0x78] sm:$0xff]  ;;  %v584_v52 = vmul.u32 2654435761, %v564_v17 }
  0xfa   :  { %v338_v51 = vadd.f32 %v322_v6, %v241_v0  ;;  %v1596_v48 = vadd.f32 %v414_v55, %v1464_v54  ;;  %v331_v55 = vmul.f32 %v1445_v30, %v1489_v41  ;;  %v680_v5 = vmul.u32 2146121005, %v664_v14 }
  0xfe   :  { %v399_v7 = vpop.permute.xlu2 %398 }
  0xff   :  { %v199_v54 = vpop.permute.xlu0 %198  ;;  %v363_v18 = vpop.permute.xlu1 %362  ;;  %v426_v8 = vmul.f32 %v1508_v13, %v399_v7  ;;  %v601_v7 = vadd.s32 %v1598_v60, %v584_v52 }
 0x100   :  { %v244_v12 = vadd.f32 %v199_v54, %v148_v50  ;;  %v417_v27 = vmul.f32 %v1508_v13, %v363_v18  ;;  %1131 = vset.pattern.permute.xlu2 %v1167_v36  ;;  %1130 = vset.pattern.permute.xlu1 %v1165_v4  ;;  %v617_v36 = vadd.s32 %v1621_v58, %v600_v24 }
 0x101   :  { %v1615_v61 = vadd.f32 %v426_v8, %v1533_v28  ;;  %507 = vperm.xlu2 %1131, %v1292_v16   ;;  %961 = vperm.xlu1 %1130, %v899_v15   ;;  %v151_v28 = vmul.f32 %v1391_v45, %v1360_v33  ;;  %v900_v16 = vld [vmem:[%s1801_s5 + $0x60] sm:$0xff]  ;;  %v565_v15 = vadd.s32 24, %v1578_v3  ;;  %v618_v30 = vadd.s32 %v1621_v58, %v601_v7 }
 0x102   :  { %v341_v19 = vadd.f32 %v325_v9, %v244_v12  ;;  %v1624_v21 = vadd.f32 %v417_v27, %v1454_v47  ;;  %v1063_v22 = vshrl.u32 %v617_v36, 16  ;;  %v901_v47 = vld [vmem:[%s1801_s5 + $0x68] sm:$0xff]  ;;  %v1078_v9 = vshrl.u32 %v680_v5, 15 }
 0x103   :  { %v585_v8 = vmul.u32 2654435761, %v565_v15 }
 0x104   :  { %v665_v46 = vxor.u32 %v1063_v22, %v617_v36  ;;  %v728_v32 = vxor.u32 %v1078_v9, %v680_v5  ;;  %v572_v36 = vadd.s32 80, %v1578_v3  ;;  %v1064_v22 = vshrl.u32 %v618_v30, 16 }
 0x105   :  { %v570_v5 = vadd.s32 64, %v1578_v3 }
 0x106   :  { %v411_v56 = vpop.permute.xlu2 %410 }
 0x107   :  { %v214_v11 = vpop.permute.xlu0 %213  ;;  %v371_v25 = vpop.permute.xlu1 %370  ;;  %v429_v26 = vmul.f32 %v1508_v13, %v411_v56 }
 0x108   :  { %v247_v49 = vadd.f32 %v214_v11, %v151_v28  ;;  %v419_v33 = vmul.f32 %v1508_v13, %v371_v25  ;;  %v569_v28 = vadd.s32 56, %v1578_v3  ;;  %v602_v11 = vadd.s32 %v1598_v60, %v585_v8 }
 0x109   :  { %v1641_v38 = vadd.f32 %v429_v26, %v1555_v39  ;;  %966 = vperm.xlu1 %1130, %v900_v16   ;;  %1132 = vset.pattern.permute.xlu2 %v1165_v4  ;;  %v681_v39 = vmul.u32 2146121005, %v665_v46  ;;  %v566_v4 = vadd.s32 32, %v1578_v3  ;;  %v567_v25 = vadd.s32 40, %v1578_v3 }
 0x10a   :  { %v344_v2 = vadd.f32 %v328_v43, %v247_v49  ;;  %v1644_v20 = vadd.f32 %v419_v33, %v338_v51  ;;  %971 = vperm.xlu2 %1132, %v901_v47   ;;  %v744_v47 = vmul.u32 2221713035, %v728_v32  ;;  %v592_v49 = vmul.u32 2654435761, %v572_v36 }
 0x10b   :  { %v1079_v50 = vshrl.u32 %v681_v39, 15  ;;  %v586_v24 = vmul.u32 2654435761, %v566_v4  ;;  %v589_v33 = vmul.u32 2654435761, %v569_v28  ;;  %v666_v46 = vxor.u32 %v1064_v22, %v618_v30 }
 0x10c   :  { %v1094_v52 = vshrl.u32 %v744_v47, 16  ;;  %v571_v4 = vadd.s32 72, %v1578_v3  ;;  %v1695_v32 = vperm.slane %v1388_v44, 3 }
 0x10d   :  { %v729_v54 = vxor.u32 %v1079_v50, %v681_v39  ;;  %v603_v12 = vadd.s32 %v1598_v60, %v586_v24  ;;  %v682_v50 = vmul.u32 2146121005, %v666_v46 }
 0x10e   :  { %v792_v9 = vxor.u32 %v1094_v52, %v744_v47 }
 0x10f   :  { %v229_v6 = vpop.permute.xlu0 %228  ;;  %v383_v0 = vpop.permute.xlu1 %382  ;;  %v745_v16 = vmul.u32 2221713035, %v729_v54  ;;  %v620_v26 = vadd.s32 %v1621_v58, %v603_v12  ;;  %v590_v12 = vmul.u32 2654435761, %v570_v5 }
 0x110   :  { %v250_v23 = vadd.f32 %v229_v6, %v154_v62  ;;  %v422_v51 = vmul.f32 %v1508_v13, %v383_v0  ;;  %v1656_v59 = vpop.permute.xlu2 %455  ;;  %v587_v62 = vmul.u32 2654435761, %v567_v25  ;;  %v609_v0 = vadd.s32 %v1598_v60, %v592_v49 }
 0x111   :  { %981 = vperm.xlu1 %1130, %v903_v63   ;;  %v1095_v29 = vshrl.u32 %v745_v16, 16  ;;  %v1066_v63 = vshrl.u32 %v620_v26, 16 }
 0x112   :  { %v347_v37 = vadd.f32 %v331_v55, %v250_v23  ;;  %v1658_v45 = vadd.f32 %v422_v51, %v341_v19  ;;  %v568_v19 = vadd.s32 48, %v1578_v3  ;;  %v606_v55 = vadd.s32 %v1598_v60, %v589_v33 }
 0x113   :  { %v793_v51 = vxor.u32 %v1095_v29, %v745_v16  ;;  %v668_v24 = vxor.u32 %v1066_v63, %v620_v26  ;;  %v626_v30 = vadd.s32 %v1621_v58, %v609_v0  ;;  %v607_v29 = vadd.s32 %v1598_v60, %v590_v12 }
 0x114   :  { %v588_v43 = vmul.u32 2654435761, %v568_v19  ;;  %v623_v8 = vadd.s32 %v1621_v58, %v606_v55 }
 0x115   :  { %v684_v16 = vmul.u32 2146121005, %v668_v24  ;;  %v1072_v26 = vshrl.u32 %v626_v30, 16 }
 0x116   :  { %v605_v6 = vadd.s32 %v1598_v60, %v588_v43  ;;  %v1069_v49 = vshrl.u32 %v623_v8, 16 }
 0x117   :  { %v1663_v41 = vpop.permute.xlu0 %911  ;;  %v395_v18 = vpop.permute.xlu1 %394 }
 0x118   :  { %v425_v27 = vmul.f32 %v1508_v13, %v395_v18  ;;  %v622_v54 = vadd.s32 %v1621_v58, %v605_v6  ;;  %v591_v18 = vmul.u32 2654435761, %v571_v4  ;;  %v671_v4 = vxor.u32 %v1069_v49, %v623_v8 }
 0x119   :  { %v1669_v57 = vpop.permute.xlu2 %463 }
 0x11a   :  { %v1672_v56 = vadd.f32 %v425_v27, %v344_v2  ;;  %v619_v2 = vadd.s32 %v1621_v58, %v602_v11  ;;  %v1080_v27 = vshrl.u32 %v682_v50, 15  ;;  %v808_v11 = vand.u32 16777215, %v792_v9 }
 0x11b   :  { %v1068_v25 = vshrl.u32 %v622_v54, 16  ;;  %v608_v43 = vadd.s32 %v1598_v60, %v591_v18 }
 0x11c   :  { %v1065_v15 = vshrl.u32 %v619_v2, 16 }
 0x11d   :  { %v670_v63 = vxor.u32 %v1068_v25, %v622_v54  ;;  %v625_v0 = vadd.s32 %v1621_v58, %v608_v43 }
 0x11e   :  { %v667_v36 = vxor.u32 %v1065_v15, %v619_v2  ;;  %v824_v2 = vcvt.s32.f32 %v808_v11 }
 0x11f   :  { %v1677_v17 = vpop.permute.xlu0 %936  ;;  %v407_v14 = vpop.permute.xlu1 %406  ;;  %v686_v54 = vmul.u32 2146121005, %v670_v63  ;;  %v1071_v12 = vshrl.u32 %v625_v0, 16 }
 0x120   :  { %v428_v39 = vmul.f32 %v1508_v13, %v407_v14  ;;  %v604_v13 = vadd.s32 %v1598_v60, %v587_v62  ;;  %v683_v44 = vmul.u32 2146121005, %v667_v36  ;;  %v730_v14 = vxor.u32 %v1080_v27, %v682_v50 }
 0x121   :  { %v1688_v7 = vpop.permute.xlu2 %475  ;;  %v1082_v62 = vshrl.u32 %v684_v16, 15  ;;  %v840_v18 = vmul.f32 5.9604645e-08, %v824_v2  ;;  %v687_v27 = vmul.u32 2146121005, %v671_v4  ;;  %v573_v36 = vadd.s32 88, %v1578_v3 }
 0x122   :  { %v1685_v23 = vadd.f32 %v428_v39, %v347_v37  ;;  %v809_v37 = vand.u32 16777215, %v793_v51  ;;  %v621_v28 = vadd.s32 %v1621_v58, %v604_v13  ;;  %v674_v39 = vxor.u32 %v1072_v26, %v626_v30 }
 0x123   :  { %v624_v51 = vadd.s32 %v1621_v58, %v607_v29  ;;  %v1081_v5 = vshrl.u32 %v683_v44, 15  ;;  %v746_v13 = vmul.u32 2221713035, %v730_v14  ;;  %v732_v24 = vxor.u32 %v1082_v62, %v684_v16 }
 0x124   :  { %v825_v33 = vcvt.s32.f32 %v809_v37  ;;  %v1067_v46 = vshrl.u32 %v621_v28, 16  ;;  %v690_v30 = vmul.u32 2146121005, %v674_v39  ;;  %vm856_vm1 = vcmp.ge.f32.partialorder %v840_v18, 0.4 }
 0x125   :  { %v1070_v8 = vshrl.u32 %v624_v51, 16  ;;  %v748_v16 = vmul.u32 2221713035, %v732_v24  ;;  %v1084_v25 = vshrl.u32 %v686_v54, 15  ;;  %v1096_v26 = vshrl.u32 %v746_v13, 16 }
 0x126   :  { %v841_v55 = vmul.f32 5.9604645e-08, %v825_v33  ;;  %v669_v15 = vxor.u32 %v1067_v46, %v621_v28  ;;  %v731_v28 = vxor.u32 %v1081_v5, %v683_v44  ;;  %v673_v33 = vxor.u32 %v1071_v12, %v625_v0 }
 0x127   :  { %v1697_v19 = vpop.permute.xlu0 %951  ;;  %v1085_v29 = vshrl.u32 %v687_v27, 15  ;;  %v672_v46 = vxor.u32 %v1070_v8, %v624_v51  ;;  %v593_v14 = vmul.u32 2654435761, %v573_v36  ;;  %v734_v44 = vxor.u32 %v1084_v25, %v686_v54 }
 0x128   :  { %v452_v22 = vpop.permute.xlu1 %451  ;;  %vm857_vm0 = vcmp.ge.f32.partialorder %v841_v55, 0.4  ;;  %v685_v11 = vmul.u32 2146121005, %v669_v15  ;;  %v747_v63 = vmul.u32 2221713035, %v731_v28  ;;  %v794_v24 = vxor.u32 %v1096_v26, %v746_v13 }
 0x129   :  { %v512_v47 = vmul.f32 %v1695_v32, %v452_v22  ;;  %v1704_v6 = vpop.permute.xlu2 %487  ;;  %v689_v15 = vmul.u32 2146121005, %v673_v33  ;;  %v688_v0 = vmul.u32 2146121005, %v672_v46  ;;  %v610_v51 = vadd.s32 %v1598_v60, %v593_v14 }
 0x12a   :  { %v1083_v39 = vshrl.u32 %v685_v11, 15  ;;  %v750_v8 = vmul.u32 2221713035, %v734_v44  ;;  %v810_v28 = vand.u32 16777215, %v794_v24 }
 0x12b   :  { %v528_v52 = vadd.f32 %v512_v47, %v1521_v1  ;;  %v1088_v47 = vshrl.u32 %v690_v30, 15  ;;  %v1087_v54 = vshrl.u32 %v689_v15, 15  ;;  %v627_v25 = vadd.s32 %v1621_v58, %v610_v51 }
 0x12c   :  { %v826_v14 = vcvt.s32.f32 %v810_v28 }
 0x12d   :  { %v544_v37 = vmax.f32 %v528_v52, 0.0  ;;  %v1098_v52 = vshrl.u32 %v748_v16, 16  ;;  %v738_v5 = vxor.u32 %v1088_v47, %v690_v30  ;;  %v576_v30 = vadd.s32 112, %v1578_v3 }
 0x12e   :  { %v737_v46 = vxor.u32 %v1087_v54, %v689_v15 }
 0x12f   :  { %v873_v43 = vsel %vm857_vm0, %v544_v37, 0.0  ;;  %v1097_v37 = vshrl.u32 %v747_v63, 16  ;;  %v796_v12 = vxor.u32 %v1098_v52, %v748_v16  ;;  %v754_v36 = vmul.u32 2221713035, %v738_v5 }
 0x130   :  { %v448_v9 = vpop.permute.xlu0 %447  ;;  %v1708_v50 = vpop.permute.xlu1 %459  ;;  %v753_v15 = vmul.u32 2221713035, %v737_v46 }
 0x131   :  { %v511_v1 = vmul.f32 %v1695_v32, %v448_v9  ;;  %v735_v9 = vxor.u32 %v1085_v29, %v687_v27  ;;  %v1086_v27 = vshrl.u32 %v688_v0, 15  ;;  %v795_v26 = vxor.u32 %v1097_v37, %v747_v63 }
 0x132   :  { %v907_v62 = vpop.permute.xlu2 %906  ;;  %v1104_v16 = vshrl.u32 %v754_v36, 16 }
 0x133   :  { %v527_v22 = vadd.f32 %v511_v1, %v1596_v48  ;;  %v985_v48 = vmul.f32 %v1663_v41, %v873_v43  ;;  %v733_v1 = vxor.u32 %v1083_v39, %v685_v11  ;;  %v574_v41 = vadd.s32 96, %v1578_v3 }
 0x134   :  { %v751_v13 = vmul.u32 2221713035, %v735_v9  ;;  %v812_v43 = vand.u32 16777215, %v796_v12  ;;  %v513_v39 = vmul.f32 %v1695_v32, %v1656_v59  ;;  %v736_v52 = vxor.u32 %v1086_v27, %v688_v0 }
 0x135   :  { %v543_v49 = vmax.f32 %v527_v22, 0.0  ;;  %v575_v22 = vadd.s32 104, %v1578_v3  ;;  %v749_v47 = vmul.u32 2221713035, %v733_v1  ;;  %v594_v29 = vmul.u32 2654435761, %v574_v41 }
 0x136   :  { %v811_v63 = vand.u32 16777215, %v795_v26  ;;  %v828_v5 = vcvt.s32.f32 %v812_v43  ;;  %v802_v9 = vxor.u32 %v1104_v16, %v754_v36  ;;  %v842_v1 = vmul.f32 5.9604645e-08, %v826_v14 }
 0x137   :  { %v872_v2 = vsel %vm856_vm1, %v543_v49, 0.0  ;;  %v1100_v49 = vshrl.u32 %v750_v8, 16  ;;  %v595_v33 = vmul.u32 2654435761, %v575_v22  ;;  %v1099_v44 = vshrl.u32 %v749_v47, 16 }
 0x138   :  { %v984_v4 = vmul.f32 %v907_v62, %v872_v2  ;;  %v1714_v55 = vpop.permute.xlu1 %471  ;;  %v596_v62 = vmul.u32 2654435761, %v576_v30  ;;  %v1101_v2 = vshrl.u32 %v751_v13, 16  ;;  %v611_v37 = vadd.s32 %v1598_v60, %v594_v29  ;;  %v468_v29 = vpop.permute.xlu0 %467 }
 0x139   :  { %v798_v24 = vxor.u32 %v1100_v49, %v750_v8  ;;  %v612_v51 = vadd.s32 %v1598_v60, %v595_v33  ;;  %v529_v59 = vadd.f32 %v513_v39, %v1576_v42  ;;  %v752_v0 = vmul.u32 2221713035, %v736_v52 }
 0x13a   :  { %v1716_v18 = vadd.f32 %v985_v48, %v984_v4  ;;  %v1073_v4 = vshrl.u32 %v627_v25, 16  ;;  %v577_v48 = vadd.s32 120, %v1578_v3  ;;  %v613_v12 = vadd.s32 %v1598_v60, %v596_v62  ;;  %v922_v8 = vpop.permute.xlu2 %921 }
 0x13b   :  { %v799_v22 = vxor.u32 %v1101_v2, %v751_v13  ;;  %v514_v3 = vmul.f32 %v1695_v32, %v1708_v50  ;;  %v827_v28 = vcvt.s32.f32 %v811_v63  ;;  %v797_v36 = vxor.u32 %v1099_v44, %v749_v47 }
 0x13c   :  { %v675_v41 = vxor.u32 %v1073_v4, %v627_v25  ;;  %v597_v54 = vmul.u32 2654435761, %v577_v48  ;;  %v1734_v30 = vmul.f32 5.9604645e-08, %v828_v5  ;;  %v814_v27 = vand.u32 16777215, %v798_v24 }
 0x13d   :  { %v818_v43 = vand.u32 16777215, %v802_v9  ;;  %v629_v49 = vadd.s32 %v1621_v58, %v612_v51  ;;  %v628_v13 = vadd.s32 %v1621_v58, %v611_v37  ;;  %v515_v42 = vmul.f32 %v1695_v32, %v1669_v57 }
 0x13e   :  { %v1103_v25 = vshrl.u32 %v753_v15, 16  ;;  %v630_v16 = vadd.s32 %v1621_v58, %v613_v12  ;;  %v815_v50 = vand.u32 16777215, %v799_v22  ;;  %v545_v33 = vmax.f32 %v529_v59, 0.0 }
 0x13f   :  { %v1102_v47 = vshrl.u32 %v752_v0, 16  ;;  %v691_v46 = vmul.u32 2146121005, %v675_v41  ;;  %v614_v14 = vadd.s32 %v1598_v60, %v597_v54  ;;  %v530_v62 = vadd.f32 %v514_v3, %v1624_v21 }
 0x140   :  { %v1723_v11 = vpop.permute.xlu1 %483  ;;  %v843_v2 = vmul.f32 5.9604645e-08, %v827_v28  ;;  %v813_v39 = vand.u32 16777215, %v797_v36  ;;  %vm858_vm2 = vcmp.ge.f32.partialorder %v842_v1, 0.4  ;;  %v830_v52 = vcvt.s32.f32 %v814_v27 }
 0x141   :  { %v1745_v4 = vcvt.s32.f32 %v818_v43  ;;  %v1075_v48 = vshrl.u32 %v629_v49, 16  ;;  %v1074_v57 = vshrl.u32 %v628_v13, 16  ;;  %v531_v63 = vadd.f32 %v515_v42, %v1545_v35 }
 0x142   :  { %v801_v44 = vxor.u32 %v1103_v25, %v753_v15  ;;  %v1076_v5 = vshrl.u32 %v630_v16, 16  ;;  %vm860_vm3 = vcmp.ge.f32.partialorder %v1734_v30, 0.4  ;;  %v831_v24 = vcvt.s32.f32 %v815_v50  ;;  %v932_v3 = vpop.permute.xlu2 %931 }
 0x143   :  { %v800_v9 = vxor.u32 %v1102_v47, %v752_v0  ;;  %v874_v51 = vsel %vm858_vm2, %v545_v33, 0.0  ;;  %v1089_v60 = vshrl.u32 %v691_v46, 15  ;;  %v631_v21 = vadd.s32 %v1621_v58, %v614_v14 }
 0x144   :  { %v546_v37 = vmax.f32 %v530_v62, 0.0  ;;  %v516_v1 = vmul.f32 %v1695_v32, %v468_v29  ;;  %v517_v12 = vmul.f32 %v1695_v32, %v1714_v55  ;;  %v829_v22 = vcvt.s32.f32 %v813_v39 }
 0x145   :  { %v846_v59 = vmul.f32 5.9604645e-08, %v830_v52  ;;  %vm859_vm4 = vcmp.ge.f32.partialorder %v843_v2, 0.4  ;;  %v677_v35 = vxor.u32 %v1075_v48, %v629_v49  ;;  %v676_v15 = vxor.u32 %v1074_v57, %v628_v13  ;;  %v480_v49 = vpop.permute.xlu0 %479 }
 0x146   :  { %v547_v41 = vmax.f32 %v531_v63, 0.0  ;;  %v817_v54 = vand.u32 16777215, %v801_v44  ;;  %v678_v0 = vxor.u32 %v1076_v5, %v630_v16  ;;  %v1753_v36 = vmul.f32 5.9604645e-08, %v831_v24 }
 0x147   :  { %v816_v27 = vand.u32 16777215, %v800_v9  ;;  %v739_v43 = vxor.u32 %v1089_v60, %v691_v46  ;;  %v1077_v42 = vshrl.u32 %v631_v21, 16  ;;  %v532_v25 = vadd.f32 %v516_v1, %v1644_v20 }
 0x148   :  { %v1736_v26 = vpop.permute.xlu1 %495  ;;  %v533_v55 = vadd.f32 %v517_v12, %v1570_v34  ;;  %v875_v50 = vsel %vm859_vm4, %v546_v37, 0.0  ;;  %v845_v33 = vmul.f32 5.9604645e-08, %v829_v22  ;;  %v693_v47 = vmul.u32 2146121005, %v677_v35 }
 0x149   :  { %v987_v29 = vmul.f32 %v922_v8, %v875_v50  ;;  %v692_v14 = vmul.u32 2146121005, %v676_v15  ;;  %v518_v16 = vmul.f32 %v1695_v32, %v1688_v7  ;;  %vm862_vm5 = vcmp.ge.f32.partialorder %v846_v59, 0.4 }
 0x14a   :  { %v833_v62 = vcvt.s32.f32 %v817_v54  ;;  %v694_v2 = vmul.u32 2146121005, %v678_v0  ;;  %v832_v46 = vcvt.s32.f32 %v816_v27  ;;  %v755_v52 = vmul.u32 2221713035, %v739_v43  ;;  %v947_v35 = vpop.permute.xlu2 %946 }
 0x14b   :  { %v679_v20 = vxor.u32 %v1077_v42, %v631_v21  ;;  %v548_v48 = vmax.f32 %v532_v25, 0.0  ;;  %v549_v34 = vmax.f32 %v533_v55, 0.0  ;;  %v519_v57 = vmul.f32 %v1695_v32, %v480_v49 }
 0x14c   :  { %v520_v8 = vmul.f32 %v1695_v32, %v1723_v11  ;;  %vm861_vm6 = vcmp.ge.f32.partialorder %v845_v33, 0.4  ;;  %v1091_v63 = vshrl.u32 %v693_v47, 15  ;;  %v1090_v7 = vshrl.u32 %v692_v14, 15 }
 0x14d   :  { %v534_v44 = vadd.f32 %v518_v16, %v1525_v53  ;;  %v521_v5 = vmul.f32 %v1695_v32, %v1704_v6  ;;  %v849_v24 = vmul.f32 5.9604645e-08, %v833_v62  ;;  %v1092_v9 = vshrl.u32 %v694_v2, 15 }
 0x14e   :  { %v848_v60 = vmul.f32 5.9604645e-08, %v832_v46  ;;  %v1105_v37 = vshrl.u32 %v755_v52, 16  ;;  %v695_v1 = vmul.u32 2146121005, %v679_v20  ;;  %v878_v11 = vsel %vm862_vm5, %v549_v34, 0.0 }
 0x14f   :  { %v535_v12 = vadd.f32 %v519_v57, %v1658_v45  ;;  %v536_v30 = vadd.f32 %v520_v8, %v1593_v31  ;;  %v877_v22 = vsel %vm861_vm6, %v548_v48, 0.0  ;;  %v740_v6 = vxor.u32 %v1090_v7, %v692_v14 }
 0x150   :  { %v989_v53 = vmul.f32 %v932_v3, %v877_v22  ;;  %v550_v54 = vmax.f32 %v534_v44, 0.0  ;;  %vm865_vm7 = vcmp.ge.f32.partialorder %v849_v24, 0.4  ;;  %vm863_vm8 = vcmp.ge.f32.partialorder %v1753_v36, 0.4 }
 0x151   :  { %v917_v28 = vpop.permute.xlu1 %916  ;;  %v537_v59 = vadd.f32 %v521_v5, %v1550_v10  ;;  %v990_v0 = vmul.f32 %v1677_v17, %v878_v11  ;;  %v742_v45 = vxor.u32 %v1092_v9, %v694_v2  ;;  %v551_v31 = vmax.f32 %v535_v12, 0.0 }
 0x152   :  { %v986_v58 = vmul.f32 %v917_v28, %v874_v51  ;;  %v850_v28 = vmul.f32 5.9604645e-08, %v1745_v4  ;;  %v803_v43 = vxor.u32 %v1105_v37, %v755_v52  ;;  %v1093_v42 = vshrl.u32 %v695_v1, 15  ;;  %v957_v46 = vpop.permute.xlu2 %956 }
 0x153   :  { %vm864_vm9 = vcmp.ge.f32.partialorder %v848_v60, 0.4  ;;  %v756_v55 = vmul.u32 2221713035, %v740_v6  ;;  %v879_v33 = vsel %vm863_vm8, %v550_v54, 0.0  ;;  %v523_v12 = vmul.f32 %v1695_v32, %v1736_v26 }
 0x154   :  { %v1001_v13 = vadd.f32 %v1716_v18, %v986_v58  ;;  %v876_v18 = vsel %vm860_vm3, %v547_v41, 0.0  ;;  %v741_v41 = vxor.u32 %v1091_v63, %v693_v47  ;;  %v552_v58 = vmax.f32 %v536_v30, 0.0  ;;  %v492_v47 = vpop.permute.xlu0 %491 }
 0x155   :  { %vm866_vm10 = vcmp.ge.f32.partialorder %v850_v28, 0.4  ;;  %v758_v4 = vmul.u32 2221713035, %v742_v45  ;;  %v880_v49 = vsel %vm864_vm9, %v551_v31, 0.0  ;;  %v1106_v2 = vshrl.u32 %v756_v55, 16 }
 0x156   :  { %v1002_v39 = vadd.f32 %v1001_v13, %v987_v29  ;;  %v757_v25 = vmul.u32 2221713035, %v741_v41  ;;  %v553_v29 = vmax.f32 %v537_v59, 0.0  ;;  %v881_v10 = vsel %vm865_vm7, %v552_v58, 0.0 }
 0x157   :  { %v819_v17 = vand.u32 16777215, %v803_v43  ;;  %v743_v13 = vxor.u32 %v1093_v42, %v695_v1  ;;  %v992_v14 = vmul.f32 %v947_v35, %v880_v49  ;;  %v1108_v52 = vshrl.u32 %v758_v4, 16 }
 0x158   :  { %v1107_v62 = vshrl.u32 %v757_v25, 16  ;;  %v522_v48 = vmul.f32 %v1695_v32, %v492_v47  ;;  %v882_v34 = vsel %vm866_vm10, %v553_v29, 0.0  ;;  %v804_v44 = vxor.u32 %v1106_v2, %v756_v55 }
 0x159   :  { %v927_v51 = vpop.permute.xlu1 %926  ;;  %v835_v57 = vcvt.s32.f32 %v819_v17  ;;  %v759_v8 = vmul.u32 2221713035, %v743_v13  ;;  %v806_v5 = vxor.u32 %v1108_v52, %v758_v4  ;;  %v539_v6 = vadd.f32 %v523_v12, %v1615_v61 }
 0x15a   :  { %v988_v21 = vmul.f32 %v927_v51, %v876_v18  ;;  %v994_v18 = vmul.f32 %v957_v46, %v882_v34  ;;  %v805_v63 = vxor.u32 %v1107_v62, %v757_v25  ;;  %v538_v51 = vadd.f32 %v522_v48, %v1672_v56 }
 0x15b   :  { %v1109_v37 = vshrl.u32 %v759_v8, 16  ;;  %v822_v1 = vand.u32 16777215, %v806_v5  ;;  %v508_v54 = vpop.permute.xlu2 %507  ;;  %v555_v43 = vmax.f32 %v539_v6, 0.0 }
 0x15c   :  { %v1003_v15 = vadd.f32 %v1002_v39, %v988_v21  ;;  %v993_v39 = vmul.f32 %v1697_v19, %v881_v10  ;;  %v821_v60 = vand.u32 16777215, %v805_v63  ;;  %v851_v21 = vmul.f32 5.9604645e-08, %v835_v57  ;;  %v504_v22 = vpop.permute.xlu0 %503 }
 0x15d   :  { %v820_v19 = vand.u32 16777215, %v804_v44  ;;  %v554_v11 = vmax.f32 %v538_v51, 0.0  ;;  %v838_v41 = vcvt.s32.f32 %v822_v1  ;;  %v525_v56 = vmul.f32 %v1695_v32, %v504_v22 }
 0x15e   :  { %v1004_v27 = vadd.f32 %v1003_v15, %v989_v53  ;;  %v837_v35 = vcvt.s32.f32 %v821_v60  ;;  %vm867_vm11 = vcmp.ge.f32.partialorder %v851_v21, 0.4  ;;  %v807_v15 = vxor.u32 %v1109_v37, %v759_v8 }
 0x15f   :  { %v836_v53 = vcvt.s32.f32 %v820_v19  ;;  %v541_v42 = vadd.f32 %v525_v56, %v1685_v23  ;;  %v854_v55 = vmul.f32 5.9604645e-08, %v838_v41  ;;  %v1022_v8 = vstv %s1797_s1  ;;  %s1168_s1 = smov [#allocation4]  }
 0x160   :  { %v1005_v3 = vadd.f32 %v1004_v27, %v990_v0  ;;  %v883_v0 = vsel %vm867_vm11, %v554_v11, 0.0  ;;  %v853_v45 = vmul.f32 5.9604645e-08, %v837_v35  ;;  %v823_v31 = vand.u32 16777215, %v807_v15  ;;  %s1051_s19 = sshll.u32 %s1168_s1, 4  ;;  %s1052_s19 = int_to_ptr.vmem [resolvable:$true] %s1051_s19 }
 0x161   :  { %v942_v50 = vpop.permute.xlu1 %941  ;;  %v852_v26 = vmul.f32 5.9604645e-08, %v836_v53  ;;  %vm870_vm14 = vcmp.ge.f32.partialorder %v854_v55, 0.4 }
 0x162   :  { %v991_v36 = vmul.f32 %v942_v50, %v879_v33  ;;  %vm869_vm12 = vcmp.ge.f32.partialorder %v853_v45, 0.4  ;;  %v839_v61 = vcvt.s32.f32 %v823_v31  ;;  %v557_v50 = vmax.f32 %v541_v42, 0.0 }
 0x163   :  { %vm868_vm13 = vcmp.ge.f32.partialorder %v852_v26, 0.4 }
 0x164   :  { %v1006_v16 = vadd.f32 %v1005_v3, %v991_v36  ;;  %v526_v3 = vmul.f32 %v1695_v32, %v508_v54  ;;  %v972_v33 = vpop.permute.xlu2 %971  ;;  %v884_v36 = vsel %vm868_vm13, %v555_v43, 0.0  ;;  %v855_v49 = vmul.f32 5.9604645e-08, %v839_v61  ;;  %v977_v17 = vpop.permute.xlu0 %976 }
 0x165   :  { %v886_v47 = vsel %vm870_vm14, %v557_v50, 0.0 }
 0x166   :  { %v1007_v20 = vadd.f32 %v1006_v16, %v992_v14  ;;  %v998_v14 = vmul.f32 %v977_v17, %v886_v47  ;;  %vm871_vm15 = vcmp.ge.f32.partialorder %v855_v49, 0.4 }
 0x168   :  { %v1008_v7 = vadd.f32 %v1007_v20, %v993_v39 }
 0x16a   :  { %v500_v24 = vpop.permute.xlu1 %499  ;;  %v1009_v9 = vadd.f32 %v1008_v7, %v994_v18 }
 0x16b   :  { %v524_v30 = vmul.f32 %v1695_v32, %v500_v24 }
 0x16d   :  { %v540_v28 = vadd.f32 %v524_v30, %v1574_v40  ;;  %v542_v40 = vadd.f32 %v526_v3, %v1641_v38 }
 0x16f   :  { %v556_v25 = vmax.f32 %v540_v28, 0.0  ;;  %v558_v32 = vmax.f32 %v542_v40, 0.0 }
 0x171   :  { %v885_v29 = vsel %vm869_vm12, %v556_v25, 0.0  ;;  %v887_v46 = vsel %vm871_vm15, %v558_v32, 0.0 }
 0x172   :  { %v997_v13 = vmul.f32 %v972_v33, %v885_v29 }
 0x173   :  { %v962_v59 = vpop.permute.xlu1 %961 }
 0x174   :  { %v995_v27 = vmul.f32 %v962_v59, %v883_v0 }
 0x176   :  { %v1010_v58 = vadd.f32 %v1009_v9, %v995_v27 }
 0x17b   :  { %v967_v4 = vpop.permute.xlu1 %966 }
 0x17c   :  { %v996_v10 = vmul.f32 %v967_v4, %v884_v36 }
 0x17e   :  { %v1011_v23 = vadd.f32 %v1010_v58, %v996_v10 }
 0x180   :  { %v1012_v16 = vadd.f32 %v1011_v23, %v997_v13 }
 0x182   :  { %v1013_v62 = vadd.f32 %v1012_v16, %v998_v14 }
 0x183   :  { %v982_v2 = vpop.permute.xlu1 %981 }
 0x184   :  { %v999_v39 = vmul.f32 %v982_v2, %v887_v46 }
 0x186   :  { %v1014_v38 = vadd.f32 %v1013_v62, %v999_v39 }
 0x188   :  { %v1015_v52 = vrot.slane %v1014_v38, 4 }
 0x18a   :  { %v1016_v20 = vadd.f32 %v1015_v52, %v1014_v38 }
 0x18c   :  { %v1017_v48 = vrot.slane %v1016_v20, 2 }
 0x18e   :  { %v1018_v34 = vadd.f32 %v1017_v48, %v1016_v20 }
 0x190   :  { %v1019_v57 = vrot.slane %v1018_v34, 1 }
 0x192   :  { %v1020_v18 = vadd.f32 %v1019_v57, %v1018_v34 }
 0x194   :  { %v1023_v63 = vadd.f32 %v1022_v8, %v1020_v18 }
 0x196   :  { %v1024_v7 = vsub.f32 0.0, %v1023_v63 }
 0x198   :  { %v1025_v44 = vmul.f32 1.442695, %v1024_v7 }
 0x19a   :  { %1134 = vpow2.f32 %v1025_v44 }
 0x1a0   :  { %v1135_v5 = vpop.eup %1134 }
 0x1a1   :  { %v1027_v24 = vadd.f32 1.0, %v1135_v5 }
 0x1a3   :  { %1136 = vrcp.f32 %v1027_v24  ;;  %v1039_v21 = vand.u32 2147483648, %v1027_v24  ;;  %v1037_v37 = vand.u32 2147483647, %v1027_v24  ;;  %vm1033_vm1 = vweird.f32 %v1027_v24 }
 0x1a5   :  { %v1040_v11 = vor.u32 1.1754944e-38, %v1039_v21  ;;  %vm1038_vm3 = vcmp.eq.f32.partialorder %v1037_v37, 8.507059e+37 }
 0x1a9   :  { %v1137_v9 = vpop.eup %1136 }
 0x1aa   :  { %v1029_v51 = vmul.f32 %v1137_v9, %v1027_v24  ;;  %vm1034_vm0 = vweird.f32 %v1137_v9 }
 0x1ab   :  { %vm1035_vm2 = vmor %vm1033_vm1, %vm1034_vm0 }
 0x1ac   :  { %v1030_v60 = vsub.f32 1.0, %v1029_v51 }
 0x1ae   :  { %v1031_v19 = vmul.f32 %v1137_v9, %v1030_v60 }
 0x1b0   :  { %v1032_v1 = vadd.f32 %v1137_v9, %v1031_v19 }
 0x1b2   :  { %v1036_v12 = vsel %vm1035_vm2, %v1137_v9, %v1032_v1 }
 0x1b3   :  { %v1041_v30 = vsel %vm1038_vm3, %v1040_v11, %v1036_v12 }
 0x1b4   :  { %v1043_v22 = vsub.f32 1.0, %v1041_v30  ;;  %1045 = vst [vmem:[#allocation4 + $0x1] sm:$0x1] %v1041_v30 }
 0x1b6   :  { %1044 = vst [vmem:[#allocation4] sm:$0x1] %v1043_v22 }
 0x1b7   :  { %1056 = dma.vmem_to_hbm [thread:$0]  %s1052_s19, 32, %s1054_s22, [#allocation5]  }
 0x1b8   :  { %1162 = dma.done.wait [#allocation5], 32  }
 0x1b9   :  { %1163 = vsyncadd [#allocation5], 4294967264 }
 0x1ba   :  { %1061 = vsyncpa [#allocation5], 1 }

</bundles_post_ra>
